<compile_context>
chip_gen: v5e
topology: v5e:2x2
jax: 0.10.0
libtpu: 0.0.40
codegen_flags: <defaults>
</compile_context>

<pallas_src>
import functools

import jax
import jax.numpy as jnp
from jax.experimental import pallas as pl
from jax.experimental.pallas import tpu as pltpu


def mlp_kernel(xt_ref, w1_ref, b1_ref, w2_ref, b2_ref, w3_ref, b3_ref,
               w4_ref, b4_ref, o_ref, *, compute_dtype):
    cd = compute_dtype
    xt = xt_ref[...].astype(cd)                                   # (in, tb)

    # Layers 1-3: (out, in) @ (in, tb) on the MXU (f32 accumulate),
    # column-vector bias broadcast + ReLU on the VPU.
    h = jnp.dot(w1_ref[...], xt, preferred_element_type=jnp.float32)
    h = jnp.maximum(h + b1_ref[...], 0.0)                         # (h1, tb)

    h = jnp.dot(w2_ref[...], h.astype(cd), preferred_element_type=jnp.float32)
    h = jnp.maximum(h + b2_ref[...], 0.0)                         # (h2, tb)

    h = jnp.dot(w3_ref[...], h.astype(cd), preferred_element_type=jnp.float32)
    h = jnp.maximum(h + b3_ref[...], 0.0)                         # (h3, tb)

    # Final layer: (1, h3) @ (h3, tb) -> lane-dense (1, tb) output tile.
    y = jnp.dot(w4_ref[...], h.astype(cd), preferred_element_type=jnp.float32)
    o_ref[...] = (y + b4_ref[0, 0]).astype(o_ref.dtype)


def _cdiv(a, b):
    return -(-a // b)


def _round_up(n, m):
    return _cdiv(n, m) * m


def mlp_forward(x, params, *, block_rows=8192, compute_dtype=jnp.float32):
    """x: (batch, in_dim) f32.  params: PyTorch-layout (W (out,in), b (out,))."""
    (w1, b1), (w2, b2), (w3, b3), (w4, b4) = params
    batch, in_dim = x.shape
    h1, h2, h3, out_dim = w1.shape[0], w2.shape[0], w3.shape[0], w4.shape[0]
    assert out_dim == 1, "kernel specializes the final layer to outData == 1"

    lanes = 128
    # Adaptive tiling: split the batch into blocks of <= block_rows rows,
    # lane-align each block, so padding is < 128 rows per block.
    num_blocks = max(1, _cdiv(batch, block_rows))
    # v7x has 2 TensorCores: give the "parallel" grid axis >= 2 steps when the
    # batch is big enough to keep both lane-dense.
    if num_blocks == 1 and batch >= 2 * lanes:
        num_blocks = 2
    tb = _round_up(_cdiv(batch, num_blocks), lanes)
    padded = tb * num_blocks

    # One XLA transpose: batch ends up on the lane axis inside the kernel.
    xt = x.T                                                      # (in, batch)
    if padded != batch:
        xt = jnp.pad(xt, ((0, 0), (0, padded - batch)))

    cd = compute_dtype
    # Cast resident weights once here (not per grid step inside the kernel).
    w1c, w2c, w3c, w4c = (w.astype(cd) for w in (w1, w2, w3, w4))
    b1c = b1.reshape(h1, 1).astype(jnp.float32)
    b2c = b2.reshape(h2, 1).astype(jnp.float32)
    b3c = b3.reshape(h3, 1).astype(jnp.float32)
    b4s = b4.reshape(1, 1).astype(jnp.float32)                    # SMEM scalar

    def resident(shape):
        # Constant block index: DMA'd once, VMEM-resident across the grid.
        return pl.BlockSpec(shape, lambda i: (0, 0))

    in_specs = [
        pl.BlockSpec((in_dim, tb), lambda i: (0, i)),             # xT tile
        resident((h1, in_dim)), resident((h1, 1)),                # W1, b1
        resident((h2, h1)), resident((h2, 1)),                    # W2, b2
        resident((h3, h2)), resident((h3, 1)),                    # W3, b3
        resident((out_dim, h3)),                                  # W4
        pl.BlockSpec(memory_space=pltpu.MemorySpace.SMEM),        # b4 scalar
    ]
    out_specs = pl.BlockSpec((out_dim, tb), lambda i: (0, i))

    flops = 2 * padded * (in_dim * h1 + h1 * h2 + h2 * h3 + h3 * out_dim)
    bytes_accessed = 4 * (padded * (in_dim + out_dim)
                          + in_dim * h1 + h1 * h2 + h2 * h3 + h3 * out_dim
                          + h1 + h2 + h3 + out_dim)

    yt = pl.pallas_call(
        functools.partial(mlp_kernel, compute_dtype=cd),
        out_shape=jax.ShapeDtypeStruct((out_dim, padded), jnp.float32),
        grid=(num_blocks,),
        in_specs=in_specs,
        out_specs=out_specs,
        compiler_params=pltpu.CompilerParams(
            dimension_semantics=("parallel",),
            vmem_limit_bytes=32 * 1024 * 1024),
        cost_estimate=pl.CostEstimate(flops=flops, transcendentals=0,
                                      bytes_accessed=bytes_accessed),
    )(xt, w1c, b1c, w2c, b2c, w3c, b3c, w4c, b4s)

    return yt[:, :batch].T                                        # (batch, 1)


def init_linear(key, fan_in, fan_out):
    # Mirrors PyTorch nn.Linear default init: U(-1/sqrt(fan_in), 1/sqrt(fan_in))
    kw, kb = jax.random.split(key)
    bound = 1.0 / jnp.sqrt(jnp.float32(fan_in))
    # PyTorch layout: W (out_features, in_features), b (out_features,)
    w = jax.random.uniform(kw, (fan_out, fan_in), jnp.float32, -bound, bound)
    b = jax.random.uniform(kb, (fan_out,), jnp.float32, -bound, bound)
    return w, b


def reference_forward(x, params):
    (w1, b1), (w2, b2), (w3, b3), (w4, b4) = params
    h = jnp.maximum(x @ w1.T + b1, 0.0)
    h = jnp.maximum(h @ w2.T + b2, 0.0)
    h = jnp.maximum(h @ w3.T + b3, 0.0)
    return h @ w4.T + b4


if __name__ == "__main__":
    inputData, h1, h2, h3, outData = 13, 26, 26, 26, 1
    batch = 333  # not lane-aligned: exercises padding + multi-block grid

    key = jax.random.PRNGKey(0)
    kx, k1, k2, k3, k4 = jax.random.split(key, 5)

    x = jax.random.normal(kx, (batch, inputData), jnp.float32)
    params = (
        init_linear(k1, inputData, h1),
        init_linear(k2, h1, h2),
        init_linear(k3, h2, h3),
        init_linear(k4, h3, outData),
    )

    y_ref = reference_forward(x, params)

    # Default config: adaptive tiling forces a 2-step grid here (v7x 2-TC path).
    y = mlp_forward(x, params)
    jax.block_until_ready(y)
    assert y.shape == (batch, outData)
    assert jnp.allclose(y, y_ref, atol=1e-5, rtol=1e-5)

    # Small tiles: several grid steps, weights stay resident across them.
    y_small = mlp_forward(x, params, block_rows=128)
    jax.block_until_ready(y_small)
    assert jnp.allclose(y_small, y_ref, atol=1e-5, rtol=1e-5)

    # Optional bf16-operand path (f32 accumulation), weights cast once in the
    # wrapper; validate numerically with a loose tolerance.
    y_bf16 = mlp_forward(x, params, block_rows=128, compute_dtype=jnp.bfloat16)
    jax.block_until_ready(y_bf16)
    assert jnp.allclose(y_bf16, y_ref, atol=1e-1, rtol=1e-1)

    print("KERNEL_OK")
</pallas_src>

<mosaic_0001>
module attributes {stable_mosaic.version = 11 : i64} {
  func.func @mlp_kernel(%arg0: i32, %arg1: memref<13x256xf32, #tpu.memory_space<vmem>>, %arg2: memref<26x13xf32, #tpu.memory_space<vmem>>, %arg3: memref<26x1xf32, #tpu.memory_space<vmem>>, %arg4: memref<26x26xf32, #tpu.memory_space<vmem>>, %arg5: memref<26x1xf32, #tpu.memory_space<vmem>>, %arg6: memref<26x26xf32, #tpu.memory_space<vmem>>, %arg7: memref<26x1xf32, #tpu.memory_space<vmem>>, %arg8: memref<1x26xf32, #tpu.memory_space<vmem>>, %arg9: memref<1x1xf32, #tpu.memory_space<smem>>, %arg10: memref<1x256xf32, #tpu.memory_space<vmem>>) attributes {dimension_semantics = [#tpu.dimension_semantics<parallel>], iteration_bounds = array<i64: 2>, scalar_prefetch = 0 : i64, scratch_operands = 0 : i64, tpu.core_type = #tpu.core_type<tc>, window_params = [{transform_indices = @transform_0, window_bounds = array<i64: 13, 256>}, {pipeline_mode = #tpu.pipeline_mode<synchronous>, transform_indices = @transform_1, window_bounds = array<i64: 26, 13>}, {pipeline_mode = #tpu.pipeline_mode<synchronous>, transform_indices = @transform_2, window_bounds = array<i64: 26, 1>}, {pipeline_mode = #tpu.pipeline_mode<synchronous>, transform_indices = @transform_3, window_bounds = array<i64: 26, 26>}, {pipeline_mode = #tpu.pipeline_mode<synchronous>, transform_indices = @transform_4, window_bounds = array<i64: 26, 1>}, {pipeline_mode = #tpu.pipeline_mode<synchronous>, transform_indices = @transform_5, window_bounds = array<i64: 26, 26>}, {pipeline_mode = #tpu.pipeline_mode<synchronous>, transform_indices = @transform_6, window_bounds = array<i64: 26, 1>}, {pipeline_mode = #tpu.pipeline_mode<synchronous>, transform_indices = @transform_7, window_bounds = array<i64: 1, 26>}, {transform_indices = @transform_8, window_bounds = array<i64: 1, 1>}, {transform_indices = @transform_9, window_bounds = array<i64: 1, 256>}]} {
    %c0 = arith.constant 0 : index
    %c0_0 = arith.constant 0 : index
    %0 = vector.load %arg1[%c0, %c0_0] : memref<13x256xf32, #tpu.memory_space<vmem>>, vector<13x256xf32>
    %c0_1 = arith.constant 0 : index
    %c0_2 = arith.constant 0 : index
    %1 = vector.load %arg2[%c0_1, %c0_2] : memref<26x13xf32, #tpu.memory_space<vmem>>, vector<26x13xf32>
    %cst = arith.constant dense<0.000000e+00> : vector<26x256xf32>
    %2 = tpu.matmul %1, %0, %cst {dimension_numbers = #tpu.dot_dimension_numbers<[1], [0], [0], [1], [0, 0, 1, 1], [], []>} : vector<26x13xf32>, vector<13x256xf32>, vector<26x256xf32> -> vector<26x256xf32>
    %c0_3 = arith.constant 0 : index
    %c0_4 = arith.constant 0 : index
    %3 = vector.load %arg3[%c0_3, %c0_4] : memref<26x1xf32, #tpu.memory_space<vmem>>, vector<26x1xf32>
    %4 = vector.broadcast %3 : vector<26x1xf32> to vector<26x256xf32>
    %5 = arith.addf %2, %4 : vector<26x256xf32>
    %cst_5 = arith.constant 0.000000e+00 : f32
    %6 = vector.broadcast %cst_5 : f32 to vector<26x256xf32>
    %7 = arith.maximumf %5, %6 : vector<26x256xf32>
    %c0_6 = arith.constant 0 : index
    %c0_7 = arith.constant 0 : index
    %8 = vector.load %arg4[%c0_6, %c0_7] : memref<26x26xf32, #tpu.memory_space<vmem>>, vector<26x26xf32>
    %cst_8 = arith.constant dense<0.000000e+00> : vector<26x256xf32>
    %9 = tpu.matmul %8, %7, %cst_8 {dimension_numbers = #tpu.dot_dimension_numbers<[1], [0], [0], [1], [0, 0, 1, 1], [], []>} : vector<26x26xf32>, vector<26x256xf32>, vector<26x256xf32> -> vector<26x256xf32>
    %c0_9 = arith.constant 0 : index
    %c0_10 = arith.constant 0 : index
    %10 = vector.load %arg5[%c0_9, %c0_10] : memref<26x1xf32, #tpu.memory_space<vmem>>, vector<26x1xf32>
    %11 = vector.broadcast %10 : vector<26x1xf32> to vector<26x256xf32>
    %12 = arith.addf %9, %11 : vector<26x256xf32>
    %cst_11 = arith.constant 0.000000e+00 : f32
    %13 = vector.broadcast %cst_11 : f32 to vector<26x256xf32>
    %14 = arith.maximumf %12, %13 : vector<26x256xf32>
    %c0_12 = arith.constant 0 : index
    %c0_13 = arith.constant 0 : index
    %15 = vector.load %arg6[%c0_12, %c0_13] : memref<26x26xf32, #tpu.memory_space<vmem>>, vector<26x26xf32>
    %cst_14 = arith.constant dense<0.000000e+00> : vector<26x256xf32>
    %16 = tpu.matmul %15, %14, %cst_14 {dimension_numbers = #tpu.dot_dimension_numbers<[1], [0], [0], [1], [0, 0, 1, 1], [], []>} : vector<26x26xf32>, vector<26x256xf32>, vector<26x256xf32> -> vector<26x256xf32>
    %c0_15 = arith.constant 0 : index
    %c0_16 = arith.constant 0 : index
    %17 = vector.load %arg7[%c0_15, %c0_16] : memref<26x1xf32, #tpu.memory_space<vmem>>, vector<26x1xf32>
    %18 = vector.broadcast %17 : vector<26x1xf32> to vector<26x256xf32>
    %19 = arith.addf %16, %18 : vector<26x256xf32>
    %cst_17 = arith.constant 0.000000e+00 : f32
    %20 = vector.broadcast %cst_17 : f32 to vector<26x256xf32>
    %21 = arith.maximumf %19, %20 : vector<26x256xf32>
    %c0_18 = arith.constant 0 : index
    %c0_19 = arith.constant 0 : index
    %22 = vector.load %arg8[%c0_18, %c0_19] : memref<1x26xf32, #tpu.memory_space<vmem>>, vector<1x26xf32>
    %cst_20 = arith.constant dense<0.000000e+00> : vector<1x256xf32>
    %23 = tpu.matmul %22, %21, %cst_20 {dimension_numbers = #tpu.dot_dimension_numbers<[1], [0], [0], [1], [0, 0, 1, 1], [], []>} : vector<1x26xf32>, vector<26x256xf32>, vector<1x256xf32> -> vector<1x256xf32>
    %c0_21 = arith.constant 0 : index
    %c0_22 = arith.constant 0 : index
    %24 = memref.load %arg9[%c0_21, %c0_22] : memref<1x1xf32, #tpu.memory_space<smem>>
    %25 = vector.broadcast %24 : f32 to vector<1x256xf32>
    %26 = arith.addf %23, %25 : vector<1x256xf32>
    %c0_23 = arith.constant 0 : index
    %c0_24 = arith.constant 0 : index
    %27 = vector.load %arg10[%c0_23, %c0_24] : memref<1x256xf32, #tpu.memory_space<vmem>>, vector<1x256xf32>
    tpu.vector_store %arg10[%c0_23, %c0_24], %26 {strides = array<i32>} : memref<1x256xf32, #tpu.memory_space<vmem>>, vector<1x256xf32>,
    return
  }
  func.func @transform_0(%arg0: i32) -> (i32, i32) {
    %c0_i32 = arith.constant 0 : i32
    %c0_i32_0 = arith.constant 0 : i32
    return %c0_i32, %arg0 : i32, i32
  }
  func.func @transform_1(%arg0: i32) -> (i32, i32) {
    %c0_i32 = arith.constant 0 : i32
    %c0_i32_0 = arith.constant 0 : i32
    %c0_i32_1 = arith.constant 0 : i32
    return %c0_i32, %c0_i32_0 : i32, i32
  }
  func.func @transform_2(%arg0: i32) -> (i32, i32) {
    %c0_i32 = arith.constant 0 : i32
    %c0_i32_0 = arith.constant 0 : i32
    %c0_i32_1 = arith.constant 0 : i32
    return %c0_i32, %c0_i32_0 : i32, i32
  }
  func.func @transform_3(%arg0: i32) -> (i32, i32) {
    %c0_i32 = arith.constant 0 : i32
    %c0_i32_0 = arith.constant 0 : i32
    %c0_i32_1 = arith.constant 0 : i32
    return %c0_i32, %c0_i32_0 : i32, i32
  }
  func.func @transform_4(%arg0: i32) -> (i32, i32) {
    %c0_i32 = arith.constant 0 : i32
    %c0_i32_0 = arith.constant 0 : i32
    %c0_i32_1 = arith.constant 0 : i32
    return %c0_i32, %c0_i32_0 : i32, i32
  }
  func.func @transform_5(%arg0: i32) -> (i32, i32) {
    %c0_i32 = arith.constant 0 : i32
    %c0_i32_0 = arith.constant 0 : i32
    %c0_i32_1 = arith.constant 0 : i32
    return %c0_i32, %c0_i32_0 : i32, i32
  }
  func.func @transform_6(%arg0: i32) -> (i32, i32) {
    %c0_i32 = arith.constant 0 : i32
    %c0_i32_0 = arith.constant 0 : i32
    %c0_i32_1 = arith.constant 0 : i32
    return %c0_i32, %c0_i32_0 : i32, i32
  }
  func.func @transform_7(%arg0: i32) -> (i32, i32) {
    %c0_i32 = arith.constant 0 : i32
    %c0_i32_0 = arith.constant 0 : i32
    %c0_i32_1 = arith.constant 0 : i32
    return %c0_i32, %c0_i32_0 : i32, i32
  }
  func.func @transform_8(%arg0: i32) -> (i32, i32) {
    %c0_i32 = arith.constant 0 : i32
    %c0_i32_0 = arith.constant 0 : i32
    %c0_i32_1 = arith.constant 0 : i32
    return %c0_i32, %c0_i32_0 : i32, i32
  }
  func.func @transform_9(%arg0: i32) -> (i32, i32) {
    %c0_i32 = arith.constant 0 : i32
    %c0_i32_0 = arith.constant 0 : i32
    return %c0_i32, %arg0 : i32, i32
  }
}

</mosaic_0001>

<bundles_post_ra>
// kernel: tpu_custom_call.1
= control target key start
LH: loop header
LB: loop body
LE: loop exit
PB: predicated region body
PF: predicated region fallthrough
CT: control target
= control target key end

     0   :  { %s1263_s0 = inlined_call_operand.vmem [shape: f32[13,512], index: 0, kind: input, shape index: {}]   ;;  %s1264_s1 = inlined_call_operand.vmem [shape: f32[26,13], index: 1, kind: input, shape index: {}]   ;;  %s1265_s2 = inlined_call_operand.vmem [shape: f32[26,1], index: 2, kind: input, shape index: {}]   ;;  %s1266_s3 = inlined_call_operand.vmem [shape: f32[26,26], index: 3, kind: input, shape index: {}]   ;;  %s1267_s4 = inlined_call_operand.vmem [shape: f32[26,1], index: 4, kind: input, shape index: {}]   ;;  %s1268_s5 = inlined_call_operand.vmem [shape: f32[26,26], index: 5, kind: input, shape index: {}]   ;;  %s1269_s6 = inlined_call_operand.vmem [shape: f32[26,1], index: 6, kind: input, shape index: {}]   ;;  %s1270_s7 = inlined_call_operand.vmem [shape: f32[1,26], index: 7, kind: input, shape index: {}]   ;;  %s1271_s8 = inlined_call_operand.<no memory space> [shape: f32[1,1], index: 8, kind: input, shape index: {}]   ;;  %s1272_s9 = inlined_call_operand.hbm [shape: f32[1,512], index: 9, kind: output, shape index: {}]  }
   0x1   :  { %14 = sst [smem:[#allocation2]] %s1271_s8 }
   0x2   :  { %15 = vsyncpa [#allocation5], 0 }
   0x3   :  { %17 = vsyncpa [#allocation5 + $0x1], 0  ;;  %s1061_s11 = smov 0   ;;  %s1063_s12 = smov 0  }
   0x4   :  { %s1065_s13 = smov 0   ;;  %s1067_s14 = smov 0  }
   0x5 LB: > { %s847_s8 = sadd.s32 4294967295, %s1005_s14   ;;  %s848_s15 = sadd.s32 4294967294, %s1005_s14   ;;  %s1005_s14 = sphi %s1067_s14, %s1278_s14   ;;  %s1001_s13 = sphi %s1065_s13, %s1277_s13   ;;  %s997_s12 = sphi %s1063_s12, %s1276_s12   ;;  %s993_s11 = sphi %s1061_s11, %s1275_s11  }
   0x6   : > { %s1084_s16 = sadd.s32 1, %s1005_s14   ;;  %s30_s17 = sadd.s32 1, %s1001_s13 }
   0x7   : > { %s27_s18 = ssub.s32 %s1005_s14, %s1084_s16  ;;  %p37_p0 = scmp.ne.s32.totalorder %s1001_s13, %s997_s12 }
   0x8   : > { %p28_p1 = scmp.eq.s32.totalorder %s27_s18, 0  ;;  %p38_p2 = scmp.eq.s32.totalorder %s1005_s14, 0 }
   0x9   : > { %p235_p3 = scmp.eq.s32.totalorder %s847_s8, 1  ;;  %p240_p4 = scmp.ne.s32.totalorder %s997_s12, %s993_s11 }
   0xa   : > { %s1097_s19 = scalar_select %p28_p1, %s1001_s13, %s30_s17  }
   0xb   : > { %p39_p5 = por %p38_p2, %p37_p0  ;;  %p1099_p6 = por %p235_p3, %p37_p0 }
   0xc   : > { %p241_p7 = scmp.eq.s32.totalorder %s848_s15, 1  ;;  %p850_p9 = scmp.ge.s32.totalorder %s1005_s14, 2 }
   0xe   : > { %p1103_p8 = por %p241_p7, %p240_p4  ;;  %281 = sbr.rel (%p850_p9) target bundleno = 27 (0x1b), region = 48 }
  0x13   : > { %284 = sbr.rel (!%p39_p5) target bundleno = 27 (0x1b), region = 52  ;;  %s286_s22 = sand.u32 (%p39_p5), 1, %s1001_s13  }
  0x14   : > { %s895_s23 = sshll.u32 (%p39_p5), %s1005_s14, 4  ;;  %s851_s24 = sshll.u32 (%p39_p5), %s286_s22, 5 }
  0x15   : > { %s291_s27 = scalar_lea.vmem (%p39_p5), %s1263_s0, %s895_s23  ;;  %s288_s28 = scalar_lea.vmem (%p39_p5), [#allocation3], %s851_s24 }
  0x16   : > { %v304_v0 = vld [vmem:[%s291_s27] sm:$0xff] (%p39_p5)  ;;  %v306_v1 = vld [vmem:[%s291_s27 + $0x8] sm:$0xff] (%p39_p5) }
  0x17   : > { %v308_v2 = vld [vmem:[%s291_s27 + $0x20] sm:$0xff] (%p39_p5)  ;;  %305 = vst [vmem:[%s288_s28] sm:$0xff] (%p39_p5), %v304_v0  ;;  %v310_v3 = vld [vmem:[%s291_s27 + $0x28] sm:$0xff] (%p39_p5) }
  0x18   : > { %307 = vst [vmem:[%s288_s28 + $0x8] sm:$0xff] %v306_v1 }
  0x19   : > { %309 = vst [vmem:[%s288_s28 + $0x10] sm:$0xff] %v308_v2 }
  0x1a   : > { %311 = vst [vmem:[%s288_s28 + $0x18] sm:$0xff] %v310_v3 }
  0x1b PF: > { %p854_p10 = scmp.ge.s32.totalorder %s1005_s14, 1  ;;  %p316_p11 = scmp.lt.s32.totalorder %s1005_s14, 3 }
  0x1d   : > { %p317_p12 = pnand %p854_p10, %p316_p11 }
  0x1e   : > { %s1121_s10 = sand.u32 (!%p317_p12), 1, %s997_s12   ;;  %s892_s23 = sshll.u32 (!%p317_p12), %s847_s8, 1 }
  0x1f   : > { %320 = sbr.rel (%p317_p12) target bundleno = 662 (0x296), region = 75  ;;  %s855_s18 = sshll.u32 (!%p317_p12), %s1121_s10, 5 }
  0x20   : > { %s325_s22 = scalar_lea.vmem (!%p317_p12), [#allocation3], %s855_s18  ;;  %s705_s18 = sld [smem:[#allocation2]] (!%p317_p12) }
  0x21   : > { %s778_s26 = scalar_lea.hbm (!%p317_p12), %s1272_s9, %s892_s23  ;;  %s768_s8 = scalar_lea.sflag (!%p317_p12), [#allocation5], %s1121_s10 }
  0x22   : > { %s782_s29 = sshll.u32 (!%p317_p12), %s778_s26, 4  ;;  %s783_s29 = int_to_ptr.hbm [resolvable:$true] %s782_s29 }
  0x23   : > { %s957_s30 = sshra.s32 (!%p317_p12), %s783_s29, 4  ;;  %s958_s30 = int_to_ptr.hbm [resolvable:$true] %s957_s30 }
  0x24   : > { %v371_v4 = vld [vmem:[%s1265_s2 + $0x18] sm:$0x3]  ;;  %v369_v5 = vld [vmem:[%s1265_s2 + $0x8] sm:$0xff]  ;;  %v1007_v6 = vmov 0   ;;  %vm405_vm0 = vcmask 1044480   ;;  %v360_v9 = vld [vmem:[%s325_s22] sm:$0xff]  ;;  %p964_p2 = scmp.lt.s32.totalorder %s958_s30, %s1272_s9 }
  0x25   : > { %940 = vset.pattern.permute.xlu0 %v1007_v6  ;;  %941 = vset.pattern.permute.xlu1 %v1007_v6  ;;  %v362_v7 = vld [vmem:[%s325_s22 + $0x10] sm:$0x1f]  ;;  %v363_v8 = vld [vmem:[%s325_s22 + $0x18] sm:$0x1f]  ;;  %v361_v10 = vld [vmem:[%s325_s22 + $0x8] sm:$0xff]  ;;  %vm392_vm1 = vcmask 105472  }
  0x26   : > { %389 = vperm.xlu0 %940, %v371_v4   ;;  %379 = vperm.xlu1 %941, %v369_v5   ;;  %v364_v11 = vld [vmem:[%s1264_s1] sm:$0xff]  ;;  %v367_v12 = vld [vmem:[%s1264_s1 + $0x18] sm:$0x3]  ;;  %v370_v13 = vld [vmem:[%s1265_s2 + $0x10] sm:$0xff]  ;;  %vm519_vm2 = vcmask 1041408   ;;  %vm506_vm3 = vcmask 211968  }
  0x27   : > { %942 = vset.pattern.permute.xlu2 %v1007_v6  ;;  %857 = vmatpush.msk.msra.mxu0 %vm405_vm0, %v362_v7  ;;  %v368_v14 = vld [vmem:[%s1265_s2] sm:$0xff]  ;;  %v365_v15 = vld [vmem:[%s1264_s1 + $0x8] sm:$0xff]  ;;  %v366_v18 = vld [vmem:[%s1264_s1 + $0x10] sm:$0xff]  ;;  %s856_s22 = sshll.u32 %s1121_s10, 1  ;;  %vm759_vm4 = vcmask 1040384   ;;  %s959_s15 = scalar_lea.hbm %s958_s30, 2 }
  0x28   : > { %862 = vmatpush.msk.msra.mxu1 %vm405_vm0, %v363_v8  ;;  %896 = vmatpush.msk.msra.mxu2 %vm405_vm0, %v362_v7  ;;  %v483_v16 = vld [vmem:[%s1267_s4 + $0x8] sm:$0xff]  ;;  %v482_v17 = vld [vmem:[%s1267_s4] sm:$0xff]  ;;  %v598_v19 = vld [vmem:[%s1269_s6 + $0x10] sm:$0xff]  ;;  %s357_s27 = scalar_lea.vmem [#allocation4], %s856_s22  ;;  %p960_p13 = scmp.ne.s32.totalorder %s958_s30, %s959_s15 }
  0x29   : > { %898 = vmatpush.msk.msra.mxu3 %vm405_vm0, %v363_v8  ;;  %427 = vmatpush.msra.mxu0 %v360_v9  ;;  %v597_v20 = vld [vmem:[%s1269_s6 + $0x8] sm:$0xff]  ;;  %v485_v43 = vld [vmem:[%s1267_s4 + $0x18] sm:$0x3]  ;;  %v478_v49 = vld [vmem:[%s1266_s3] sm:$0xff]  ;;  %s780_s28 = sshll.u32 %s357_s27, 4  ;;  %s963_s22 = scalar_lea.hbm %s1272_s9, 4  ;;  %s781_s28 = int_to_ptr.vmem [resolvable:$true] %s780_s28 }
  0x2a   : > { %456 = vmatpush.msra.mxu1 %v361_v10  ;;  %858 = vmatmul.msk.f32.vlgmr.msra.gmra.mxu0 %vm392_vm1, %v364_v11  ;;  %v484_v51 = vld [vmem:[%s1267_s4 + $0x10] sm:$0xff]  ;;  %v479_v52 = vld [vmem:[%s1266_s3 + $0x8] sm:$0xff]  ;;  %v599_v53 = vld [vmem:[%s1269_s6 + $0x18] sm:$0x3]  ;;  %p961_p0 = pnand %p960_p13, %p1099_p6  ;;  %p965_p3 = scmp.lt.s32.totalorder %s963_s22, %s959_s15 }
  0x2b   : > { %863 = vmatmul.msk.f32.vlgmr.msra.gmra.mxu1 %vm392_vm1, %v364_v11  ;;  %897 = vmatpush.msra.mxu2 %v360_v9  ;;  %v480_v54 = vld [vmem:[%s1266_s3 + $0x10] sm:$0xff]  ;;  %v596_v55 = vld [vmem:[%s1269_s6] sm:$0xff]  ;;  %v481_v56 = vld [vmem:[%s1266_s3 + $0x18] sm:$0x3] }
  0x2c   : > { %899 = vmatpush.msra.mxu3 %v361_v10  ;;  %861 = vmatmul.msk.f32.vlgmr.msra.gmra.mxu2 %vm392_vm1, %v367_v12  ;;  %p962_p1 = pneg %p961_p0  ;;  %p966_p4 = por %p965_p3, %p964_p2 }
  0x2d   : > { %866 = vmatmul.msk.f32.vlgmr.msra.gmra.mxu3 %vm392_vm1, %v367_v12  ;;  %503 = vperm.xlu2 %942, %v485_v43  }
  0x2e   : > { %384 = vperm.xlu0 %940, %v370_v13   ;;  %374 = vperm.xlu1 %941, %v368_v14   ;;  %p967_p5 = pnand %p966_p4, %p962_p1 }
  0x32   : > { %859 = vmatmul.msk.f32.gmra.mxu0 %vm392_vm1, %v365_v15 }
  0x33   : > { %864 = vmatmul.msk.f32.gmra.mxu1 %vm392_vm1, %v365_v15 }
  0x35   : > { %498 = vperm.xlu2 %942, %v484_v51  }
  0x36   : > { %493 = vperm.xlu0 %940, %v483_v16   ;;  %488 = vperm.xlu1 %941, %v482_v17  }
  0x3a   : > { %860 = vmatmul.msk.f32.gmra.mxu0 %vm392_vm1, %v366_v18 }
  0x3b   : > { %865 = vmatmul.msk.f32.gmra.mxu1 %vm392_vm1, %v366_v18 }
  0x3d   : > { %617 = vperm.xlu2 %942, %v599_v53   ;;  %v704_v53 = vld [vmem:[%s1270_s7] sm:$0x1] }
  0x3e   : > { %612 = vperm.xlu0 %940, %v598_v19   ;;  %607 = vperm.xlu1 %941, %v597_v20   ;;  %v592_v20 = vld [vmem:[%s1268_s5] sm:$0xff] }
  0x45   : > { %602 = vperm.xlu2 %942, %v596_v55  }
  0x87   : > { %v504_v61 = vpop.permute.xlu2 %503 }
  0x8f   : > { %v499_v0 = vpop.permute.xlu2 %498 }
  0x98   : > { %v390_v23 = vpop.permute.xlu0 %389  ;;  %v380_v24 = vpop.permute.xlu1 %379 }
  0xa0   : > { %v385_v33 = vpop.permute.xlu0 %384  ;;  %v375_v38 = vpop.permute.xlu1 %374 }
  0xa7   : > { %v429_v21 = vpop.f32.mrf.mxu0 }
  0xa8   : > { %v458_v22 = vpop.f32.mrf.mxu1  ;;  %v430_v41 = vadd.f32 %v429_v21, %v375_v38  ;;  %v494_v5 = vpop.permute.xlu0 %493 }
  0xa9   : > { %v459_v44 = vadd.f32 %v458_v22, %v375_v38  ;;  %v489_v10 = vpop.permute.xlu1 %488  ;;  %v593_v22 = vld [vmem:[%s1268_s5 + $0x8] sm:$0xff] }
  0xaa   : > { %v470_v48 = vmax.f32 %v430_v41, 0.0 }
  0xab   : > { %v471_v50 = vmax.f32 %v459_v44, 0.0 }
  0xaf   : > { %v432_v25 = vpop.f32.mrf.mxu0  ;;  %v438_v26 = vpop.f32.mrf.mxu2 }
  0xb0   : > { %v461_v27 = vpop.f32.mrf.mxu1  ;;  %v439_v28 = vadd.f32 %v438_v26, %v390_v23  ;;  %v467_v29 = vpop.f32.mrf.mxu3  ;;  %v433_v35 = vadd.f32 %v432_v25, %v380_v24 }
  0xb1   : > { %v468_v30 = vadd.f32 %v467_v29, %v390_v23  ;;  %v462_v39 = vadd.f32 %v461_v27, %v380_v24  ;;  %v594_v23 = vld [vmem:[%s1268_s5 + $0x10] sm:$0xff]  ;;  %v595_v24 = vld [vmem:[%s1268_s5 + $0x18] sm:$0x3] }
  0xb2   : > { %v476_v31 = vmax.f32 %v439_v28, 0.0  ;;  %v472_v46 = vmax.f32 %v433_v35, 0.0 }
  0xb3   : > { %v477_v32 = vmax.f32 %v468_v30, 0.0  ;;  %v473_v47 = vmax.f32 %v462_v39, 0.0 }
  0xb4   : > { %867 = vmatpush.msk.msrb.mxu2 %vm519_vm2, %v476_v31  ;;  %v618_v31 = vpop.permute.xlu2 %617 }
  0xb5   : > { %872 = vmatpush.msk.msrb.mxu3 %vm519_vm2, %v477_v32  ;;  %v613_v32 = vpop.permute.xlu0 %612 }
  0xb7   : > { %v435_v34 = vpop.f32.mrf.mxu0 }
  0xb8   : > { %v436_v36 = vadd.f32 %v435_v34, %v385_v33  ;;  %v464_v37 = vpop.f32.mrf.mxu1 }
  0xb9   : > { %v465_v40 = vadd.f32 %v464_v37, %v385_v33  ;;  %v608_v37 = vpop.permute.xlu1 %607 }
  0xba   : > { %v474_v42 = vmax.f32 %v436_v36, 0.0 }
  0xbb   : > { %v475_v45 = vmax.f32 %v465_v40, 0.0 }
  0xbc   : > { %539 = vmatpush.msrb.mxu2 %v474_v42  ;;  %v603_v42 = vpop.permute.xlu2 %602 }
  0xbd   : > { %568 = vmatpush.msrb.mxu3 %v475_v45 }
  0xbe   : > { %540 = vmatpush.msrb.mxu2 %v472_v46 }
  0xbf   : > { %569 = vmatpush.msrb.mxu3 %v473_v47 }
  0xc0   : > { %541 = vmatpush.msrb.mxu2 %v470_v48 }
  0xc1   : > { %570 = vmatpush.msrb.mxu3 %v471_v50  ;;  %868 = vmatmul.msk.f32.vlgmr.msrb.gmra.mxu2 %vm506_vm3, %v478_v49 }
  0xc2   : > { %873 = vmatmul.msk.f32.vlgmr.msrb.gmra.mxu3 %vm506_vm3, %v478_v49 }
  0xc9   : > { %869 = vmatmul.msk.f32.gmra.mxu2 %vm506_vm3, %v479_v52 }
  0xca   : > { %874 = vmatmul.msk.f32.gmra.mxu3 %vm506_vm3, %v479_v52 }
  0xd1   : > { %870 = vmatmul.msk.f32.gmra.mxu2 %vm506_vm3, %v480_v54 }
  0xd2   : > { %875 = vmatmul.msk.f32.gmra.mxu3 %vm506_vm3, %v480_v54  ;;  %v706_v54 = vstv %s705_s18 }
  0xd9   : > { %871 = vmatmul.msk.f32.gmra.mxu2 %vm506_vm3, %v481_v56 }
  0xda   : > { %876 = vmatmul.msk.f32.gmra.mxu3 %vm506_vm3, %v481_v56  ;;  %v762_v56 = vlaneseq }
  0xdc   : > { %vm764_vm5 = vcmp.lt.s32.totalorder %v762_v56, 256 }
 0x144   : > { %v543_v57 = vpop.f32.mrf.mxu2 }
 0x145   : > { %v572_v58 = vpop.f32.mrf.mxu3  ;;  %v544_v13 = vadd.f32 %v543_v57, %v489_v10 }
 0x146   : > { %v573_v15 = vadd.f32 %v572_v58, %v489_v10 }
 0x147   : > { %v584_v19 = vmax.f32 %v544_v13, 0.0 }
 0x148   : > { %v585_v21 = vmax.f32 %v573_v15, 0.0 }
 0x14c   : > { %v546_v59 = vpop.f32.mrf.mxu2 }
 0x14d   : > { %v575_v60 = vpop.f32.mrf.mxu3  ;;  %v547_v8 = vadd.f32 %v546_v59, %v494_v5 }
 0x14e   : > { %v576_v11 = vadd.f32 %v575_v60, %v494_v5 }
 0x14f   : > { %v586_v17 = vmax.f32 %v547_v8, 0.0 }
 0x150   : > { %v587_v18 = vmax.f32 %v576_v11, 0.0 }
 0x154   : > { %v549_v62 = vpop.f32.mrf.mxu2 }
 0x155   : > { %v578_v63 = vpop.f32.mrf.mxu3  ;;  %v550_v2 = vadd.f32 %v549_v62, %v499_v0 }
 0x156   : > { %v579_v6 = vadd.f32 %v578_v63, %v499_v0 }
 0x157   : > { %v588_v14 = vmax.f32 %v550_v2, 0.0 }
 0x158   : > { %v589_v16 = vmax.f32 %v579_v6, 0.0 }
 0x15c   : > { %v552_v1 = vpop.f32.mrf.mxu2 }
 0x15d   : > { %v553_v3 = vadd.f32 %v552_v1, %v504_v61  ;;  %v581_v4 = vpop.f32.mrf.mxu3 }
 0x15e   : > { %v582_v7 = vadd.f32 %v581_v4, %v504_v61 }
 0x15f   : > { %v590_v9 = vmax.f32 %v553_v3, 0.0 }
 0x160   : > { %v591_v12 = vmax.f32 %v582_v7, 0.0 }
 0x161   : > { %877 = vmatpush.msk.msrb.mxu0 %vm519_vm2, %v590_v9 }
 0x162   : > { %882 = vmatpush.msk.msrb.mxu1 %vm519_vm2, %v591_v12 }
 0x163   : > { %651 = vmatpush.msrb.mxu0 %v588_v14 }
 0x164   : > { %680 = vmatpush.msrb.mxu1 %v589_v16 }
 0x165   : > { %652 = vmatpush.msrb.mxu0 %v586_v17 }
 0x166   : > { %681 = vmatpush.msrb.mxu1 %v587_v18 }
 0x167   : > { %653 = vmatpush.msrb.mxu0 %v584_v19 }
 0x168   : > { %682 = vmatpush.msrb.mxu1 %v585_v21  ;;  %878 = vmatmul.msk.f32.vlgmr.msrb.gmra.mxu0 %vm506_vm3, %v592_v20 }
 0x169   : > { %883 = vmatmul.msk.f32.vlgmr.msrb.gmra.mxu1 %vm506_vm3, %v592_v20 }
 0x170   : > { %879 = vmatmul.msk.f32.gmra.mxu0 %vm506_vm3, %v593_v22 }
 0x171   : > { %884 = vmatmul.msk.f32.gmra.mxu1 %vm506_vm3, %v593_v22 }
 0x178   : > { %880 = vmatmul.msk.f32.gmra.mxu0 %vm506_vm3, %v594_v23 }
 0x179   : > { %885 = vmatmul.msk.f32.gmra.mxu1 %vm506_vm3, %v594_v23 }
 0x180   : > { %881 = vmatmul.msk.f32.gmra.mxu0 %vm506_vm3, %v595_v24 }
 0x181   : > { %886 = vmatmul.msk.f32.gmra.mxu1 %vm506_vm3, %v595_v24 }
 0x1e5   : > { %v655_v25 = vpop.f32.mrf.mxu0 }
 0x1e6   : > { %v684_v26 = vpop.f32.mrf.mxu1  ;;  %v656_v45 = vadd.f32 %v655_v25, %v603_v42 }
 0x1e7   : > { %v685_v47 = vadd.f32 %v684_v26, %v603_v42 }
 0x1e8   : > { %v696_v51 = vmax.f32 %v656_v45, 0.0 }
 0x1e9   : > { %v697_v52 = vmax.f32 %v685_v47, 0.0 }
 0x1ed   : > { %v658_v27 = vpop.f32.mrf.mxu0 }
 0x1ee   : > { %v687_v28 = vpop.f32.mrf.mxu1  ;;  %v659_v40 = vadd.f32 %v658_v27, %v608_v37 }
 0x1ef   : > { %v688_v43 = vadd.f32 %v687_v28, %v608_v37 }
 0x1f0   : > { %v698_v49 = vmax.f32 %v659_v40, 0.0 }
 0x1f1   : > { %v699_v50 = vmax.f32 %v688_v43, 0.0 }
 0x1f5   : > { %v661_v29 = vpop.f32.mrf.mxu0 }
 0x1f6   : > { %v690_v30 = vpop.f32.mrf.mxu1  ;;  %v662_v34 = vadd.f32 %v661_v29, %v613_v32 }
 0x1f7   : > { %v691_v38 = vadd.f32 %v690_v30, %v613_v32 }
 0x1f8   : > { %v700_v46 = vmax.f32 %v662_v34, 0.0 }
 0x1f9   : > { %v701_v48 = vmax.f32 %v691_v38, 0.0 }
 0x1fd   : > { %v664_v33 = vpop.f32.mrf.mxu0 }
 0x1fe   : > { %v665_v35 = vadd.f32 %v664_v33, %v618_v31  ;;  %v693_v36 = vpop.f32.mrf.mxu1 }
 0x1ff   : > { %v694_v39 = vadd.f32 %v693_v36, %v618_v31 }
 0x200   : > { %v702_v41 = vmax.f32 %v665_v35, 0.0 }
 0x201   : > { %v703_v44 = vmax.f32 %v694_v39, 0.0 }
 0x202   : > { %887 = vmatpush.msk.msra.mxu2 %vm519_vm2, %v702_v41 }
 0x203   : > { %889 = vmatpush.msk.msra.mxu3 %vm519_vm2, %v703_v44 }
 0x204   : > { %729 = vmatpush.msra.mxu2 %v700_v46 }
 0x205   : > { %749 = vmatpush.msra.mxu3 %v701_v48 }
 0x206   : > { %730 = vmatpush.msra.mxu2 %v698_v49 }
 0x207   : > { %750 = vmatpush.msra.mxu3 %v699_v50 }
 0x208   : > { %731 = vmatpush.msra.mxu2 %v696_v51 }
 0x209   : > { %751 = vmatpush.msra.mxu3 %v697_v52  ;;  %888 = vmatmul.msk.f32.vlgmr.msra.gmra.mxu2 %vm506_vm3, %v704_v53 }
 0x20a   : > { %890 = vmatmul.msk.f32.vlgmr.msra.gmra.mxu3 %vm506_vm3, %v704_v53 }
 0x28c   : > { %v733_v55 = vpop.f32.mrf.mxu2 }
 0x28d   : > { %v753_v57 = vpop.f32.mrf.mxu3  ;;  %v734_v59 = vadd.f32 %v733_v55, %v706_v54 }
 0x28e   : > { %v754_v58 = vadd.f32 %v753_v57, %v706_v54 }
 0x290   : > { %v758_v60 = vrot.slane %v754_v58, 7 }
 0x292   : > { %v760_v61 = vsel %vm759_vm4, %v734_v59, %v758_v60 }
 0x293   : > { %766 = vst.msk [vmem:[%s357_s27] sm:$0x3] %vm764_vm5, %v760_v61 }
 0x294   : > { %970 = shalt.err (!%p967_p5)
}
 0x295   : > { %900 = dma.vmem_to_hbm [thread:$0]  (%p1099_p6), %s781_s28, 32, %s783_s29, %s768_s8  }
 0x296 PF: > { %s794_s10 = sand.u32 1, %s993_s11   ;;  %p903_p7 = pnand %p850_p9, %p1103_p8 }
 0x297   : > { %s795_s25 = scalar_lea.sflag [#allocation5], %s794_s10 }
 0x298   : > { %p904_p10 = pneg %p903_p7 }
 0x29a   : > { %988 = dma.done.wait (%p904_p10), %s795_s25, 32  }
 0x29b   : > { %990 = vsyncadd (%p904_p10), %s795_s25, 4294967264  ;;  %p20_p11 = scmp.ge.s32.totalorder %s1084_s16, 4   ;;  %s1275_s11 = smov %s997_s12 }
 0x29c   : > { %s1276_s12 = smov %s1001_s13  ;;  %s1277_s13 = smov %s1097_s19 }
 0x29d   : > { %s1278_s14 = smov %s1084_s16  ;;  %22 = sbr.rel (!%p20_p11) target bundleno = 5 (0x5), region = 119 }
 0x2a2   :  { %801 = vsyncpa [#allocation5], 1 }
 0x2a3   :  { %803 = vsyncpa [#allocation5 + $0x1], 1 }

</bundles_post_ra>
